<compile_context>
chip_gen: v5e
topology: v5e:2x2
jax: 0.10.0
libtpu: 0.0.40
codegen_flags: <defaults>
</compile_context>

<pallas_src>
import functools

import jax
import jax.numpy as jnp
from jax.experimental import pallas as pl
from jax.experimental.pallas import tpu as pltpu


# ----------------------------------------------------------------------------
# Pallas kernel
# ----------------------------------------------------------------------------
def _mention_comparator_kernel(cand_ref, msum_ref, feat_ref, wb_ref, out_ref, *, M):
    # cand_ref : (TN, K, D)  candidate TransE embeddings, NaN-padded rows (VMEM)
    # msum_ref : (1, D)      sum over mention TransE embeddings           (VMEM)
    # feat_ref : (2, TN)     row 0 = cosine sim, row 1 = edit distance    (VMEM)
    # wb_ref   : (4,)        [w_cos, w_edit, w_transe, bias]              (SMEM)
    # out_ref  : (1, TN)                                                  (VMEM)
    cand = cand_ref[...]                                   # native dtype (f32/bf16)
    m_sum = msum_ref[...].astype(jnp.float32)              # (1, D)

    K = cand.shape[1]

    # pad_sequence(padding=nan) pads entire rows -> test lane 0 only, then one
    # broadcast select (no full-tensor isnan).
    is_pad = jnp.isnan(cand[:, :, 0])                      # (TN, K)
    valid = (~is_pad).astype(jnp.float32)                  # (TN, K)

    # Factored reduction: the pairwise scores are only ever summed over (K, M),
    # so  sum_{k,m} cand[n,k,:]·m[m,:] == (sum_k cand[n,k,:]) · (sum_m m[m,:]).
    # Masked K-sum kept as one fused expression; upcast after load so the
    # accumulate is f32 even for bf16 candidate storage (v5e has no bf16 VPU).
    cand_sum = jnp.sum(
        jnp.where(is_pad[:, :, None], 0.0, cand.astype(jnp.float32)),
        axis=1)                                            # (TN, D) sublane reduce

    # Skinny contractions land results lane-dense as (1, TN) directly
    # (no (N,1)->(1,N) transpose anywhere).
    total = jax.lax.dot_general(
        m_sum, cand_sum, (((1,), (1,)), ((), ())),
        preferred_element_type=jnp.float32)                # (1, TN)
    valid_rows = jax.lax.dot_general(
        jnp.ones((1, K), jnp.float32), valid, (((1,), (1,)), ((), ())),
        preferred_element_type=jnp.float32)                # (1, TN)

    # Non-NaN score count per candidate. Mention embeddings are assumed
    # NaN-free; M == 0 is handled upstream by the module (transe feature 0).
    count = valid_rows * float(M)
    means = jnp.where(count > 0.0, total / jnp.maximum(count, 1.0), 0.0)   # (1, TN)

    # Linear(3 -> 1) over [cos_sim, edit_distance, transe_score].
    cos = feat_ref[0:1, :]                                 # (1, TN)
    edit = feat_ref[1:2, :]                                # (1, TN)
    out_ref[...] = (cos * wb_ref[0] + edit * wb_ref[1]
                    + means * wb_ref[2] + wb_ref[3])


# ----------------------------------------------------------------------------
# Wrapper (glue: lane-dense layout, tiling over N, specs, grid)
# ----------------------------------------------------------------------------
# 512 keeps the double-buffered f32 candidate tile (2 x 3.2 MiB at K=8, D=200)
# comfortably inside v5e's 16 MiB scoped-VMEM default while sitting near the
# HBM roofline on v6e/v7x; multi-step grids shard across v7x's 2 TensorCores.
_BLOCK_N_CAP = 512


def mention_comparator_forward(cand_transe, m_transe, cos_sim, edit_dist,
                               lin_w, lin_b):
    """cand_transe: (N, K, D) NaN-padded; m_transe: (M, D);
    cos_sim, edit_dist: (N,); lin_w: (1, 3); lin_b: (1,). Returns (N,) f32."""
    N, K, D = cand_transe.shape
    M = m_transe.shape[0]

    # Hoisted mention reduction: one tiny XLA reduce instead of redoing it on
    # every grid step inside the kernel.
    m_sum = jnp.sum(m_transe, axis=0, keepdims=True).astype(jnp.float32)   # (1, D)

    # Lane-dense layout for the per-candidate scalars and the result.
    feats = jnp.stack([cos_sim, edit_dist], axis=0).astype(jnp.float32)    # (2, N)
    # Pack Linear(3->1) params into one SMEM vector [w_cos, w_edit, w_transe, b].
    wb = jnp.concatenate(
        [lin_w.reshape(3), lin_b.reshape(1)]).astype(jnp.float32)          # (4,)

    # Tile over N. Small N -> one full-extent block; large N -> 512-row tiles,
    # zero-padding the final tile (padded rows are computed then sliced off).
    if N <= _BLOCK_N_CAP:
        block_n, n_pad = N, N
    else:
        block_n = _BLOCK_N_CAP
        n_pad = pl.cdiv(N, block_n) * block_n
        if n_pad != N:
            cand_transe = jnp.pad(cand_transe, ((0, n_pad - N), (0, 0), (0, 0)))
            feats = jnp.pad(feats, ((0, 0), (0, n_pad - N)))
    grid = (n_pad // block_n,)

    itemsize = jnp.dtype(cand_transe.dtype).itemsize
    cost = pl.CostEstimate(
        flops=2 * n_pad * K * D + 2 * n_pad * D,
        transcendentals=0,
        bytes_accessed=(n_pad * K * D * itemsize          # candidate tensor
                        + 2 * n_pad * 4 + n_pad * 4       # feats in + out
                        + D * 4),                         # mention sum
    )

    kernel = functools.partial(_mention_comparator_kernel, M=M)
    out = pl.pallas_call(
        kernel,
        out_shape=jax.ShapeDtypeStruct((1, n_pad), jnp.float32),
        grid=grid,
        in_specs=[
            pl.BlockSpec((block_n, K, D), lambda i: (i, 0, 0)),            # candidates
            pl.BlockSpec((1, D), lambda i: (0, 0)),                        # mention sum
            pl.BlockSpec((2, block_n), lambda i: (0, i)),                  # cos / edit
            pl.BlockSpec(memory_space=pltpu.MemorySpace.SMEM),             # linear w+b
        ],
        out_specs=pl.BlockSpec((1, block_n), lambda i: (0, i)),
        compiler_params=pltpu.CompilerParams(
            dimension_semantics=("parallel",)),
        cost_estimate=cost,
    )(cand_transe, m_sum, feats, wb)
    return out[0, :N]


# ----------------------------------------------------------------------------
# Pure-JAX reference (mirrors the PyTorch forward exactly)
# ----------------------------------------------------------------------------
def reference_forward(cand_transe, m_transe, cos_sim, edit_dist, lin_w, lin_b):
    scores = jnp.einsum('nkd,md->nkm', cand_transe, m_transe)      # (N, K, M)
    scores = scores.reshape(scores.shape[0], -1)                   # (N, K*M)
    nan_idx = jnp.isnan(scores)
    all_nan = jnp.all(nan_idx, axis=1)
    mask = jnp.logical_not(nan_idx).astype(jnp.float32)
    clean = jnp.where(nan_idx, 0.0, scores)
    means = clean.sum(1) / mask.sum(1)
    means = jnp.where(all_nan, 0.0, means)                         # (N,)
    feats = jnp.stack([cos_sim, edit_dist, means], axis=1)         # (N, 3)
    return (feats @ lin_w.T + lin_b)[:, 0]


# ----------------------------------------------------------------------------
if __name__ == "__main__":
    key = jax.random.PRNGKey(0)
    k1, k2, k3, k4, k5, k6 = jax.random.split(key, 6)

    N = 8      # number of candidate containers
    K = 8      # max TransE embeddings per candidate (pad_sequence length)
    M = 4      # mention's TransE embeddings
    D = 200    # TransE embedding dim (fixed at 200 in the module)

    # Candidate TransE embeddings, variable lengths, NaN-padded (pad_sequence).
    cand_transe = jax.random.normal(k1, (N, K, D), dtype=jnp.float32)
    lengths = jnp.array([8, 5, 0, 3, 8, 1, 0, 7], dtype=jnp.int32)   # 0 => all-NaN row
    row_idx = jnp.arange(K)[None, :, None]                           # (1, K, 1)
    pad_mask = row_idx >= lengths[:, None, None]                     # (N, K, 1)
    cand_transe = jnp.where(pad_mask, jnp.nan, cand_transe)

    m_transe = jax.random.normal(k2, (M, D), dtype=jnp.float32)
    cos_sim = jax.random.uniform(k3, (N,), dtype=jnp.float32)
    edit_dist = jax.random.uniform(k4, (N,), dtype=jnp.float32) * 10.0

    # Deterministic Linear(3 -> 1) parameters (synthetic init, not a checkpoint).
    lin_w = jax.random.normal(k5, (1, 3), dtype=jnp.float32) * 0.5
    lin_b = jax.random.normal(k6, (1,), dtype=jnp.float32) * 0.1

    out = mention_comparator_forward(cand_transe, m_transe, cos_sim, edit_dist,
                                     lin_w, lin_b)
    out = jax.block_until_ready(out)

    ref = reference_forward(cand_transe, m_transe, cos_sim, edit_dist,
                            lin_w, lin_b)
    ref = jax.block_until_ready(ref)

    assert out.shape == (N,)
    assert jnp.allclose(out, ref, rtol=1e-4, atol=1e-4), (out, ref)

    # TODO(synk): combine_mentions_with_mention_embeddings / calculate_pairwise_scores
    # helper paths (not invoked by forward) are not kernelized here.
    print("KERNEL_OK")
</pallas_src>

<mosaic_0001>
module attributes {stable_mosaic.version = 11 : i64} {
  func.func @_mention_comparator_kernel(%arg0: i32, %arg1: memref<8x8x200xf32, #tpu.memory_space<vmem>>, %arg2: memref<1x200xf32, #tpu.memory_space<vmem>>, %arg3: memref<2x8xf32, #tpu.memory_space<vmem>>, %arg4: memref<4xf32, #tpu.memory_space<smem>>, %arg5: memref<1x8xf32, #tpu.memory_space<vmem>>) attributes {dimension_semantics = [#tpu.dimension_semantics<parallel>], iteration_bounds = array<i64: 1>, scalar_prefetch = 0 : i64, scratch_operands = 0 : i64, tpu.core_type = #tpu.core_type<tc>, window_params = [{transform_indices = @transform_0, window_bounds = array<i64: 8, 8, 200>}, {pipeline_mode = #tpu.pipeline_mode<synchronous>, transform_indices = @transform_1, window_bounds = array<i64: 1, 200>}, {transform_indices = @transform_2, window_bounds = array<i64: 2, 8>}, {transform_indices = @transform_3, window_bounds = array<i64: 4>}, {transform_indices = @transform_4, window_bounds = array<i64: 1, 8>}]} {
    %c0 = arith.constant 0 : index
    %c0_0 = arith.constant 0 : index
    %c0_1 = arith.constant 0 : index
    %0 = vector.load %arg1[%c0, %c0_0, %c0_1] : memref<8x8x200xf32, #tpu.memory_space<vmem>>, vector<8x8x200xf32>
    %c0_2 = arith.constant 0 : index
    %c0_3 = arith.constant 0 : index
    %1 = vector.load %arg2[%c0_2, %c0_3] : memref<1x200xf32, #tpu.memory_space<vmem>>, vector<1x200xf32>
    %2 = vector.extract_strided_slice %0 {offsets = [0, 0, 0], sizes = [8, 8, 1], strides = [1, 1, 1]} : vector<8x8x200xf32> to vector<8x8x1xf32>
    %3 = vector.shape_cast %2 : vector<8x8x1xf32> to vector<8x8xf32>
    %4 = arith.cmpf one, %3, %3 : vector<8x8xf32>
    %cst = arith.constant dense<true> : vector<8x8xi1>
    %5 = arith.xori %4, %cst : vector<8x8xi1>
    %6 = arith.extui %5 : vector<8x8xi1> to vector<8x8xi32>
    %7 = arith.sitofp %6 : vector<8x8xi32> to vector<8x8xf32>
    %8 = vector.shape_cast %4 : vector<8x8xi1> to vector<8x8x1xi1>
    %cst_4 = arith.constant 0.000000e+00 : f32
    %9 = vector.shape_cast %8 : vector<8x8x1xi1> to vector<8x8x1xi1>
    %10 = vector.broadcast %9 : vector<8x8x1xi1> to vector<8x8x200xi1>
    %11 = vector.broadcast %cst_4 : f32 to vector<8x8x200xf32>
    %12 = arith.select %10, %11, %0 : vector<8x8x200xi1>, vector<8x8x200xf32>
    %cst_5 = arith.constant dense<0.000000e+00> : vector<8x200xf32>
    %13 = vector.multi_reduction <add>, %12, %cst_5 [1] : vector<8x8x200xf32> to vector<8x200xf32>
    %cst_6 = arith.constant dense<0.000000e+00> : vector<1x8xf32>
    %14 = tpu.matmul %1, %13, %cst_6 {dimension_numbers = #tpu.dot_dimension_numbers<[1], [1], [0], [0], [0, 0, 1, 0], [], []>} : vector<1x200xf32>, vector<8x200xf32>, vector<1x8xf32> -> vector<1x8xf32>
    %cst_7 = arith.constant 1.000000e+00 : f32
    %15 = vector.broadcast %cst_7 : f32 to vector<1x8xf32>
    %cst_8 = arith.constant dense<0.000000e+00> : vector<1x8xf32>
    %16 = tpu.matmul %15, %7, %cst_8 {dimension_numbers = #tpu.dot_dimension_numbers<[1], [1], [0], [0], [0, 0, 1, 0], [], []>} : vector<1x8xf32>, vector<8x8xf32>, vector<1x8xf32> -> vector<1x8xf32>
    %cst_9 = arith.constant 4.000000e+00 : f32
    %17 = vector.broadcast %cst_9 : f32 to vector<1x8xf32>
    %18 = arith.mulf %16, %17 : vector<1x8xf32>
    %cst_10 = arith.constant 0.000000e+00 : f32
    %19 = vector.broadcast %cst_10 : f32 to vector<1x8xf32>
    %20 = arith.cmpf ogt, %18, %19 : vector<1x8xf32>
    %cst_11 = arith.constant 1.000000e+00 : f32
    %21 = vector.broadcast %cst_11 : f32 to vector<1x8xf32>
    %22 = arith.maximumf %18, %21 : vector<1x8xf32>
    %23 = arith.divf %14, %22 : vector<1x8xf32>
    %cst_12 = arith.constant 0.000000e+00 : f32
    %24 = vector.broadcast %cst_12 : f32 to vector<1x8xf32>
    %25 = arith.select %20, %23, %24 : vector<1x8xi1>, vector<1x8xf32>
    %c0_13 = arith.constant 0 : index
    %c0_14 = arith.constant 0 : index
    %26 = vector.load %arg3[%c0_13, %c0_14] : memref<2x8xf32, #tpu.memory_space<vmem>>, vector<1x8xf32>
    %c1 = arith.constant 1 : index
    %c0_15 = arith.constant 0 : index
    %27 = vector.load %arg3[%c1, %c0_15] : memref<2x8xf32, #tpu.memory_space<vmem>>, vector<1x8xf32>
    %c0_16 = arith.constant 0 : index
    %28 = memref.load %arg4[%c0_16] : memref<4xf32, #tpu.memory_space<smem>>
    %29 = vector.broadcast %28 : f32 to vector<1x8xf32>
    %30 = arith.mulf %26, %29 : vector<1x8xf32>
    %c1_17 = arith.constant 1 : index
    %31 = memref.load %arg4[%c1_17] : memref<4xf32, #tpu.memory_space<smem>>
    %32 = vector.broadcast %31 : f32 to vector<1x8xf32>
    %33 = arith.mulf %27, %32 : vector<1x8xf32>
    %34 = arith.addf %30, %33 : vector<1x8xf32>
    %c2 = arith.constant 2 : index
    %35 = memref.load %arg4[%c2] : memref<4xf32, #tpu.memory_space<smem>>
    %36 = vector.broadcast %35 : f32 to vector<1x8xf32>
    %37 = arith.mulf %25, %36 : vector<1x8xf32>
    %38 = arith.addf %34, %37 : vector<1x8xf32>
    %c3 = arith.constant 3 : index
    %39 = memref.load %arg4[%c3] : memref<4xf32, #tpu.memory_space<smem>>
    %40 = vector.broadcast %39 : f32 to vector<1x8xf32>
    %41 = arith.addf %38, %40 : vector<1x8xf32>
    %c0_18 = arith.constant 0 : index
    %c0_19 = arith.constant 0 : index
    %42 = vector.load %arg5[%c0_18, %c0_19] : memref<1x8xf32, #tpu.memory_space<vmem>>, vector<1x8xf32>
    tpu.vector_store %arg5[%c0_18, %c0_19], %41 {strides = array<i32>} : memref<1x8xf32, #tpu.memory_space<vmem>>, vector<1x8xf32>,
    return
  }
  func.func @transform_0(%arg0: i32) -> (i32, i32, i32) {
    %c0_i32 = arith.constant 0 : i32
    %c0_i32_0 = arith.constant 0 : i32
    %c0_i32_1 = arith.constant 0 : i32
    return %arg0, %c0_i32, %c0_i32_0 : i32, i32, i32
  }
  func.func @transform_1(%arg0: i32) -> (i32, i32) {
    %c0_i32 = arith.constant 0 : i32
    %c0_i32_0 = arith.constant 0 : i32
    %c0_i32_1 = arith.constant 0 : i32
    return %c0_i32, %c0_i32_0 : i32, i32
  }
  func.func @transform_2(%arg0: i32) -> (i32, i32) {
    %c0_i32 = arith.constant 0 : i32
    %c0_i32_0 = arith.constant 0 : i32
    return %c0_i32, %arg0 : i32, i32
  }
  func.func @transform_3(%arg0: i32) -> i32 {
    %c0_i32 = arith.constant 0 : i32
    %c0_i32_0 = arith.constant 0 : i32
    return %c0_i32 : i32
  }
  func.func @transform_4(%arg0: i32) -> (i32, i32) {
    %c0_i32 = arith.constant 0 : i32
    %c0_i32_0 = arith.constant 0 : i32
    return %c0_i32, %arg0 : i32, i32
  }
}

</mosaic_0001>

<bundles_post_ra>
// kernel: tpu_custom_call.1
= control target key start
LH: loop header
LB: loop body
LE: loop exit
PB: predicated region body
PF: predicated region fallthrough
CT: control target
= control target key end

     0   :  { %9 = vsyncpa [#allocation3], 0  ;;  %s855_s0 = inlined_call_operand.hbm [shape: f32[8,8,200], index: 0, kind: input, shape index: {}]   ;;  %s856_s1 = inlined_call_operand.hbm [shape: f32[1,200], index: 1, kind: input, shape index: {}]   ;;  %s857_s2 = inlined_call_operand.hbm [shape: f32[2,8], index: 2, kind: input, shape index: {}]   ;;  %s858_s3 = inlined_call_operand.vmem [shape: f32[4], index: 3, kind: input, shape index: {}]   ;;  %s859_s4 = inlined_call_operand.hbm [shape: f32[1,8], index: 4, kind: output, shape index: {}]  }
   0x1   :  { %10 = vsyncpa [#allocation7], 0 }
   0x2   :  { %11 = vsyncpa [#allocation5], 0  ;;  %s31_s17 = sshll.u32 %s856_s1, 4  ;;  %s32_s17 = int_to_ptr.hbm [resolvable:$true] %s31_s17 }
   0x3   :  { %12 = vsyncpa [#allocation4], 0  ;;  %s668_s18 = smov [#allocation6]   ;;  %s17_s22 = sshll.u32 %s855_s0, 4  ;;  %s18_s22 = int_to_ptr.hbm [resolvable:$true] %s17_s22 }
   0x4   :  { %s33_s19 = sshll.u32 %s668_s18, 4  ;;  %s669_s23 = smov [#allocation2]   ;;  %s34_s19 = int_to_ptr.vmem [resolvable:$true] %s33_s19 }
   0x5   :  { %36 = dma.hbm_to_vmem [thread:$0]  %s32_s17, 32, %s34_s19, [#allocation7]  }
   0x6   :  { %s19_s24 = sshll.u32 %s669_s23, 4  ;;  %s670_s25 = smov 256   ;;  %s20_s24 = int_to_ptr.vmem [resolvable:$true] %s19_s24 }
   0x7   :  { %s671_s26 = smov 16   ;;  %s42_s1 = sshll.u32 %s857_s2, 4  ;;  %s43_s1 = int_to_ptr.hbm [resolvable:$true] %s42_s1 }
   0x8   :  { %25 = dma.hbm_to_vmem [thread:$0]  %s18_s22, 2048, %s20_s24, [#allocation3], %s670_s25, %s670_s25, %s671_s26  }
   0x9   :  { %s672_s29 = smov [#allocation8]   ;;  %s53_s0 = sshll.u32 %s858_s3, 4  ;;  %s54_s0 = int_to_ptr.vmem [resolvable:$true] %s53_s0 }
   0xa   :  { %s44_s30 = sshll.u32 %s672_s29, 4  ;;  %s673_s7 = smov [#allocation9]   ;;  %s45_s30 = int_to_ptr.vmem [resolvable:$true] %s44_s30 }
   0xb   :  { %47 = dma.hbm_to_vmem [thread:$0]  %s43_s1, 32, %s45_s30, [#allocation7]  }
   0xc   :  { %56 = dma.vmem_to_smem %s54_s0, 16, %s673_s7, [#allocation5]  }
   0xd   :  { %660 = dma.done.wait [#allocation3], 2048  }
   0xe   :  { %661 = vsyncadd [#allocation3], 4294965248 }
   0xf   :  { %662 = dma.done.wait [#allocation7], 64  }
  0x10   :  { %663 = vsyncadd [#allocation7], 4294967232 }
  0x11   :  { %664 = dma.done.wait [#allocation5], 16  }
  0x12   :  { %665 = vsyncadd [#allocation5], 4294967280 }
  0x13   :  { %73 = sfence }
  0x14   :  { %v716_v0 = vld [vmem:[#allocation2] sm:$0xff]  ;;  %v720_v2 = vld [vmem:[#allocation2 + $0x50] sm:$0xff]  ;;  %v674_v3 = vmov 0   ;;  %vm675_vm3 = vmmov 1   ;;  %v676_v10 = vmov 0.0   ;;  %v75_v31 = vld [vmem:[#allocation2 + $0x8] sm:$0xff]  ;;  %v402_v51 = vlaneseq }
  0x15   :  { %v718_v1 = vld [vmem:[#allocation2 + $0x40] sm:$0xff]  ;;  %549 = vset.pattern.permute.xlu2 %v674_v3  ;;  %vm91_vm0 = vcmp.ne.f32.partialorder %v716_v0, %v716_v0  ;;  %538 = vset.pattern.permute.xlu1 %v674_v3  ;;  %vm96_vm2 = vcmp.ne.f32.partialorder %v720_v2, %v720_v2  ;;  %v728_v4 = vld [vmem:[#allocation2 + $0x10] sm:$0xff]  ;;  %v77_v37 = vld [vmem:[#allocation2 + $0x18] sm:$0xff]  ;;  %s466_s2 = sld [smem:[#allocation9]]  ;;  %s678_s10 = smov [#allocation10]  }
  0x16   :  { %vm95_vm1 = vcmp.ne.f32.partialorder %v718_v1, %v718_v1  ;;  %v730_v5 = vld [vmem:[#allocation2 + $0x60] sm:$0xff]  ;;  %v732_v6 = vld [vmem:[#allocation2 + $0x70] sm:$0xff]  ;;  %v123_v7 = vsel %vm91_vm0, 1, %v674_v3  ;;  %vm99_vm4 = vmxor %vm91_vm0, %vm675_vm3  ;;  %527 = vset.pattern.permute.xlu0 %v674_v3  ;;  %vm92_vm5 = vcmp.ne.f32.partialorder %v728_v4, %v728_v4  ;;  %v128_v29 = vsel %vm96_vm2, 1, %v674_v3  ;;  %s513_s3 = sld [smem:[#allocation9 + $0x1]]  ;;  %s487_s11 = sshll.u32 %s678_s10, 4  ;;  %s488_s11 = int_to_ptr.vmem [resolvable:$true] %s487_s11 }
  0x17   :  { %v737_v8 = vld [vmem:[#allocation2 + $0x20] sm:$0xff]  ;;  %132 = vperm.xlu2 %549, %v123_v7   ;;  %vm103_vm6 = vmxor %vm95_vm1, %vm675_vm3  ;;  %vm97_vm7 = vcmp.ne.f32.partialorder %v730_v5, %v730_v5  ;;  %v745_v9 = vld [vmem:[#allocation2 + $0x30] sm:$0xff]  ;;  %v501_v12 = vsel %vm99_vm4, 1.0, %v676_v10  ;;  %vm98_vm9 = vcmp.ne.f32.partialorder %v732_v6, %v732_v6  ;;  %v124_v17 = vsel %vm92_vm5, 1, %v674_v3  ;;  %s514_s8 = sld [smem:[#allocation9 + $0x2]]  ;;  %s489_s14 = sshll.u32 %s859_s4, 4  ;;  %s490_s14 = int_to_ptr.hbm [resolvable:$true] %s489_s14 }
  0x18   :  { %vm104_vm8 = vmxor %vm96_vm2, %vm675_vm3  ;;  %v505_v11 = vsel %vm103_vm6, 1.0, %v676_v10  ;;  %vm93_vm11 = vcmp.ne.f32.partialorder %v737_v8, %v737_v8  ;;  %vm94_vm13 = vcmp.ne.f32.partialorder %v745_v9, %v745_v9  ;;  %v127_v24 = vsel %vm95_vm1, 1, %v674_v3  ;;  %v83_v60 = vld [vmem:[#allocation2 + $0x48] sm:$0xff]  ;;  %s515_s9 = sld [smem:[#allocation9 + $0x3]] }
  0x19   :  { %v506_v13 = vsel %vm104_vm8, 1.0, %v676_v10  ;;  %vm100_vm10 = vmxor %vm92_vm5, %vm675_vm3  ;;  %v126_v25 = vsel %vm94_vm13, 1, %v674_v3  ;;  %v125_v26 = vsel %vm93_vm11, 1, %v674_v3  ;;  %v130_v27 = vsel %vm98_vm9, 1, %v674_v3 }
  0x1a   :  { %v539_v14 = vpack.i.bf16 %v506_v13, %v505_v11  ;;  %v502_v15 = vsel %vm100_vm10, 1.0, %v676_v10  ;;  %vm105_vm12 = vmxor %vm97_vm7, %vm675_vm3  ;;  %v129_v28 = vsel %vm97_vm7, 1, %v674_v3  ;;  %v403_v58 = vand.u32 127, %v402_v51 }
  0x1b   :  { %v528_v16 = vpack.i.bf16 %v502_v15, %v501_v12  ;;  %vm106_vm14 = vmxor %vm98_vm9, %vm675_vm3  ;;  %v507_v18 = vsel %vm105_vm12, 1.0, %v676_v10  ;;  %vm304_vm5 = vcmask 1041409   ;;  %vm306_vm6 = vcmask 1042434  }
  0x1c   :  { %540 = vperm.xlu1 %538, %v539_v14   ;;  %vm101_vm15 = vmxor %vm93_vm11, %vm675_vm3  ;;  %v508_v19 = vsel %vm106_vm14, 1.0, %v676_v10  ;;  %vm308_vm7 = vcmask 1043459   ;;  %vm310_vm8 = vcmask 1044484   ;;  %vm312_vm9 = vcmask 1045509  }
  0x1d   :  { %529 = vperm.xlu0 %527, %v528_v16   ;;  %vm102_vm0 = vmxor %vm94_vm13, %vm675_vm3  ;;  %v503_v20 = vsel %vm101_vm15, 1.0, %v676_v10  ;;  %v544_v22 = vpack.i.bf16 %v508_v19, %v507_v18  ;;  %vm185_vm3 = vcmask 588800   ;;  %vm314_vm10 = vcmask 1046534  }
  0x1e   :  { %v504_v21 = vsel %vm102_vm0, 1.0, %v676_v10  ;;  %vm316_vm11 = vcmask 1047559   ;;  %vm419_vm13 = vcmask 64512  }
  0x1f   :  { %135 = vperm.xlu2 %549, %v124_v17   ;;  %v533_v23 = vpack.i.bf16 %v504_v21, %v503_v20  ;;  %v89_v21 = vld [vmem:[#allocation2 + $0x78] sm:$0xff] }
  0x24   :  { %545 = vperm.xlu1 %538, %v544_v22  }
  0x25   :  { %534 = vperm.xlu0 %527, %v533_v23  }
  0x27   :  { %144 = vperm.xlu2 %549, %v127_v24  }
  0x2c   :  { %141 = vperm.xlu1 %538, %v126_v25  }
  0x2d   :  { %138 = vperm.xlu0 %527, %v125_v26  }
  0x2f   :  { %153 = vperm.xlu2 %549, %v130_v27  }
  0x34   :  { %150 = vperm.xlu1 %538, %v129_v28  }
  0x35   :  { %147 = vperm.xlu0 %527, %v128_v29  }
  0x71   :  { %v133_v30 = vpop.permute.xlu2 %132 }
  0x72   :  { %vm155_vm1 = vcmp.eq.s32.totalorder %v133_v30, 1 }
  0x73   :  { %v163_v32 = vsel %vm155_vm1, 0.0, %v716_v0  ;;  %v164_v33 = vsel %vm155_vm1, 0.0, %v75_v31 }
  0x74   :  { %v179_v35 = vrot.slane %v163_v32, 4  ;;  %v186_v36 = vsel %vm185_vm3, %v164_v33, 0.0 }
  0x75   :  { %v187_v38 = vrot.slane %v186_v36, 4 }
  0x76   :  { %v180_v40 = vadd.f32 %v179_v35, %v163_v32 }
  0x77   :  { %v188_v43 = vadd.f32 %v187_v38, %v186_v36  ;;  %v81_v36 = vld [vmem:[#allocation2 + $0x38] sm:$0xff] }
  0x78   :  { %v181_v45 = vrot.slane %v180_v40, 2 }
  0x79   :  { %v136_v34 = vpop.permute.xlu2 %135  ;;  %v189_v48 = vrot.slane %v188_v43, 2 }
  0x7a   :  { %vm156_vm4 = vcmp.eq.s32.totalorder %v136_v34, 1  ;;  %v182_v50 = vadd.f32 %v181_v45, %v180_v40 }
  0x7b   :  { %v166_v39 = vsel %vm156_vm4, 0.0, %v77_v37  ;;  %v165_v41 = vsel %vm156_vm4, 0.0, %v728_v4  ;;  %v802_v55 = vadd.f32 %v189_v48, %v188_v43 }
  0x7c   :  { %v199_v42 = vsel %vm185_vm3, %v166_v39, 0.0  ;;  %v193_v44 = vrot.slane %v165_v41, 4  ;;  %v183_v57 = vrot.slane %v182_v50, 1 }
  0x7d   :  { %v200_v46 = vrot.slane %v199_v42, 4  ;;  %v191_v63 = vrot.slane %v802_v55, 1 }
  0x7e   :  { %v194_v49 = vadd.f32 %v193_v44, %v165_v41  ;;  %v805_v3 = vadd.f32 %v183_v57, %v182_v50  ;;  %v79_v41 = vld [vmem:[#allocation2 + $0x28] sm:$0xff] }
  0x7f   :  { %v201_v53 = vadd.f32 %v200_v46, %v199_v42 }
  0x80   :  { %v195_v56 = vrot.slane %v194_v49, 2 }
  0x81   :  { %v145_v47 = vpop.permute.xlu2 %144  ;;  %v202_v59 = vrot.slane %v201_v53, 2 }
  0x82   :  { %vm159_vm2 = vcmp.eq.s32.totalorder %v145_v47, 1  ;;  %v196_v0 = vadd.f32 %v195_v56, %v194_v49 }
  0x83   :  { %v172_v4 = vsel %vm159_vm2, 0.0, %v83_v60  ;;  %v203_v11 = vadd.f32 %v202_v59, %v201_v53  ;;  %v171_v12 = vsel %vm159_vm2, 0.0, %v718_v1 }
  0x84   :  { %v197_v19 = vrot.slane %v196_v0, 1  ;;  %v238_v20 = vsel %vm185_vm3, %v172_v4, 0.0  ;;  %v232_v23 = vrot.slane %v171_v12, 4 }
  0x85   :  { %v204_v27 = vrot.slane %v203_v11, 1  ;;  %v239_v29 = vrot.slane %v238_v20, 4 }
  0x86   :  { %v198_v33 = vadd.f32 %v197_v19, %v196_v0  ;;  %v233_v37 = vadd.f32 %v232_v23, %v171_v12  ;;  %v87_v12 = vld [vmem:[#allocation2 + $0x68] sm:$0xff] }
  0x87   :  { %v205_v4 = vadd.f32 %v204_v27, %v203_v11  ;;  %v85_v27 = vld [vmem:[#allocation2 + $0x58] sm:$0xff] }
  0x89   :  { %v154_v7 = vpop.permute.xlu2 %153 }
  0x8a   :  { %vm162_vm12 = vcmp.eq.s32.totalorder %v154_v7, 1 }
  0x8b   :  { %v178_v30 = vsel %vm162_vm12, 0.0, %v89_v21  ;;  %v177_v38 = vsel %vm162_vm12, 0.0, %v732_v6 }
  0x8c   :  { %v277_v43 = vsel %vm185_vm3, %v178_v30, 0.0  ;;  %v271_v59 = vrot.slane %v177_v38, 4 }
  0x8e   :  { %v541_v52 = vpop.permute.xlu1 %540 }
  0x8f   :  { %v530_v54 = vpop.permute.xlu0 %529  ;;  %v542_v16 = vunpack.i.l.bf16 %v541_v52  ;;  %v543_v22 = vunpack.i.h.bf16 %v541_v52 }
  0x90   :  { %v532_v61 = vunpack.i.h.bf16 %v530_v54  ;;  %v531_v62 = vunpack.i.l.bf16 %v530_v54 }
  0x91   :  { %v408_v31 = vperm.slane %v542_v16, %v403_v58  ;;  %v409_v34 = vperm.slane %v543_v22, %v403_v58 }
  0x92   :  { %v405_v13 = vperm.slane %v532_v61, %v403_v58  ;;  %v404_v14 = vperm.slane %v531_v62, %v403_v58  ;;  %v278_v61 = vrot.slane %v277_v43, 4 }
  0x94   :  { %v412_v1 = vsel %vm304_vm5, %v405_v13, %v404_v14  ;;  %v234_v13 = vrot.slane %v233_v37, 2  ;;  %v305_v14 = vsel %vm304_vm5, %v198_v33, %v805_v3 }
  0x96   :  { %v546_v10 = vpop.permute.xlu1 %545  ;;  %v235_v30 = vadd.f32 %v234_v13, %v233_v37 }
  0x97   :  { %v535_v15 = vpop.permute.xlu0 %534  ;;  %v547_v24 = vunpack.i.l.bf16 %v546_v10  ;;  %v548_v28 = vunpack.i.h.bf16 %v546_v10 }
  0x98   :  { %v537_v17 = vunpack.i.h.bf16 %v535_v15  ;;  %v536_v18 = vunpack.i.l.bf16 %v535_v15 }
  0x99   :  { %v410_v39 = vperm.slane %v547_v24, %v403_v58  ;;  %v411_v44 = vperm.slane %v548_v28, %v403_v58 }
  0x9a   :  { %v407_v25 = vperm.slane %v537_v17, %v403_v58  ;;  %v406_v26 = vperm.slane %v536_v18, %v403_v58  ;;  %v240_v58 = vadd.f32 %v239_v29, %v238_v20  ;;  %v677_v17 = vmov 1.0  }
  0x9b   :  { %v272_v20 = vadd.f32 %v271_v59, %v177_v38 }
  0x9c   :  { %v413_v32 = vsel %vm306_vm6, %v406_v26, %v412_v1  ;;  %v241_v19 = vrot.slane %v240_v58, 2 }
  0x9d   :  { %v414_v35 = vsel %vm308_vm7, %v407_v25, %v413_v32 }
  0x9e   :  { %v142_v40 = vpop.permute.xlu1 %141  ;;  %v415_v42 = vsel %vm310_vm8, %v408_v31, %v414_v35 }
  0x9f   :  { %vm158_vm14 = vcmp.eq.s32.totalorder %v142_v40, 1  ;;  %v139_v45 = vpop.permute.xlu0 %138  ;;  %v416_v46 = vsel %vm312_vm9, %v409_v34, %v415_v42  ;;  %v273_v34 = vrot.slane %v272_v20, 2 }
  0xa0   :  { %v169_v47 = vsel %vm158_vm14, 0.0, %v745_v9  ;;  %v170_v48 = vsel %vm158_vm14, 0.0, %v81_v36  ;;  %vm157_vm15 = vcmp.eq.s32.totalorder %v139_v45, 1  ;;  %v417_v49 = vsel %vm314_vm10, %v410_v39, %v416_v46 }
  0xa1   :  { %v219_v50 = vrot.slane %v169_v47, 4  ;;  %v225_v6 = vsel %vm185_vm3, %v170_v48, 0.0  ;;  %v167_v51 = vsel %vm157_vm15, 0.0, %v737_v8  ;;  %v168_v52 = vsel %vm157_vm15, 0.0, %v79_v41 }
  0xa2   :  { %v226_v53 = vrot.slane %v225_v6, 4  ;;  %v206_v54 = vrot.slane %v167_v51, 4  ;;  %v212_v56 = vsel %vm185_vm3, %v168_v52, 0.0  ;;  %v418_v57 = vsel %vm316_vm11, %v411_v44, %v417_v49 }
  0xa3   :  { %v220_v60 = vadd.f32 %v219_v50, %v169_v47  ;;  %v213_v9 = vrot.slane %v212_v56, 4  ;;  %511 = vmatpush.xpose.msk.msra.mxu2 %vm419_vm13, %v418_v57  ;;  %v192_v8 = vadd.f32 %v191_v63, %v802_v55  ;;  %v279_v55 = vadd.f32 %v278_v61, %v277_v43 }
  0xa4   :  { %v227_v62 = vadd.f32 %v226_v53, %v225_v6  ;;  %v207_v0 = vadd.f32 %v206_v54, %v167_v51  ;;  %v242_v46 = vadd.f32 %v241_v19, %v240_v58  ;;  %v236_v49 = vrot.slane %v235_v30, 1 }
  0xa5   :  { %v221_v7 = vrot.slane %v220_v60, 2  ;;  %v214_v10 = vadd.f32 %v213_v9, %v212_v56  ;;  %v280_v35 = vrot.slane %v279_v55, 2  ;;  %v274_v51 = vadd.f32 %v273_v34, %v272_v20 }
  0xa6   :  { %v228_v15 = vrot.slane %v227_v62, 2  ;;  %v208_v16 = vrot.slane %v207_v0, 2  ;;  %512 = vmatmul.msk.f32.vlgmr.msra.gmra.mxu2 %vm419_vm13, %v677_v17  ;;  %v151_v18 = vpop.permute.xlu1 %150  ;;  %v243_v9 = vrot.slane %v242_v46, 1 }
  0xa7   :  { %v215_v21 = vrot.slane %v214_v10, 2  ;;  %vm161_vm0 = vcmp.eq.s32.totalorder %v151_v18, 1  ;;  %v148_v22 = vpop.permute.xlu0 %147  ;;  %v222_v24 = vadd.f32 %v221_v7, %v220_v60  ;;  %v281_v52 = vadd.f32 %v280_v35, %v279_v55 }
  0xa8   :  { %v209_v63 = vadd.f32 %v208_v16, %v207_v0  ;;  %v175_v11 = vsel %vm161_vm0, 0.0, %v730_v5  ;;  %v176_v23 = vsel %vm161_vm0, 0.0, %v87_v12  ;;  %v229_v1 = vadd.f32 %v228_v15, %v227_v62 }
  0xa9   :  { %v216_v25 = vadd.f32 %v215_v21, %v214_v10  ;;  %v258_v26 = vrot.slane %v175_v11, 4  ;;  %v264_v3 = vsel %vm185_vm3, %v176_v23, 0.0  ;;  %vm160_vm1 = vcmp.eq.s32.totalorder %v148_v22, 1  ;;  %v90_v21 = vld [vmem:[#allocation6] sm:$0x3] }
  0xaa   :  { %v210_v28 = vrot.slane %v209_v63, 1  ;;  %v265_v29 = vrot.slane %v264_v3, 4  ;;  %v173_v33 = vsel %vm160_vm1, 0.0, %v720_v2  ;;  %v174_v5 = vsel %vm160_vm1, 0.0, %v85_v27 }
  0xab   :  { %v217_v31 = vrot.slane %v216_v25, 1  ;;  %v259_v32 = vadd.f32 %v258_v26, %v175_v11  ;;  %v223_v38 = vrot.slane %v222_v24, 1  ;;  %v245_v40 = vrot.slane %v173_v33, 4 }
  0xac   :  { %v266_v36 = vadd.f32 %v265_v29, %v264_v3  ;;  %v251_v41 = vsel %vm185_vm3, %v174_v5, 0.0  ;;  %v230_v42 = vrot.slane %v229_v1, 1  ;;  %v211_v43 = vadd.f32 %v210_v28, %v209_v63  ;;  %v464_v5 = vld [vmem:[#allocation8] sm:$0x1] }
  0xad   :  { %v260_v39 = vrot.slane %v259_v32, 2  ;;  %v252_v45 = vrot.slane %v251_v41, 4  ;;  %v218_v47 = vadd.f32 %v217_v31, %v216_v25  ;;  %v246_v48 = vadd.f32 %v245_v40, %v173_v33 }
  0xae   :  { %v267_v44 = vrot.slane %v266_v36, 2  ;;  %v318_v2 = vsel %vm304_vm5, %v205_v4, %v192_v8  ;;  %v224_v53 = vadd.f32 %v223_v38, %v222_v24  ;;  %v231_v56 = vadd.f32 %v230_v42, %v229_v1  ;;  %v465_v38 = vld [vmem:[#allocation8 + $0x1] sm:$0x1] }
  0xaf   :  { %v261_v37 = vadd.f32 %v260_v39, %v259_v32  ;;  %v253_v6 = vadd.f32 %v252_v45, %v251_v41  ;;  %v247_v54 = vrot.slane %v246_v48, 2  ;;  %v307_v60 = vsel %vm306_vm6, %v211_v43, %v305_v14 }
  0xb0   :  { %v268_v50 = vadd.f32 %v267_v44, %v266_v36  ;;  %v319_v62 = vsel %vm306_vm6, %v218_v47, %v318_v2  ;;  %v237_v7 = vadd.f32 %v236_v49, %v235_v30  ;;  %v275_v10 = vrot.slane %v274_v51, 1 }
  0xb1   :  { %v262_v57 = vrot.slane %v261_v37, 1  ;;  %v254_v59 = vrot.slane %v253_v6, 2  ;;  %v248_v58 = vadd.f32 %v247_v54, %v246_v48  ;;  %v309_v4 = vsel %vm308_vm7, %v224_v53, %v307_v60 }
  0xb2   :  { %v269_v61 = vrot.slane %v268_v50, 1  ;;  %v282_v12 = vrot.slane %v281_v52, 1  ;;  %v320_v16 = vsel %vm308_vm7, %v231_v56, %v319_v62  ;;  %v244_v17 = vadd.f32 %v243_v9, %v242_v46 }
  0xb3   :  { %v255_v0 = vadd.f32 %v254_v59, %v253_v6  ;;  %v249_v8 = vrot.slane %v248_v58, 1  ;;  %v263_v13 = vadd.f32 %v262_v57, %v261_v37  ;;  %v311_v20 = vsel %vm310_vm8, %v237_v7, %v309_v4 }
  0xb4   :  { %v270_v18 = vadd.f32 %v269_v61, %v268_v50  ;;  %v276_v22 = vadd.f32 %v275_v10, %v274_v51  ;;  %v321_v63 = vsel %vm310_vm8, %v244_v17, %v320_v16  ;;  %v283_v23 = vadd.f32 %v282_v12, %v281_v52 }
  0xb5   :  { %v256_v15 = vrot.slane %v255_v0, 1  ;;  %v250_v19 = vadd.f32 %v249_v8, %v248_v58  ;;  %v285_v3 = vperm.slane %v90_v21, 0  ;;  %v286_v1 = vperm.slane %v90_v21, 1 }
  0xb6   :  { %v467_v39 = vstv %s466_s2  ;;  %v470_v40 = vstv %s513_s3  ;;  %v474_v2 = vstv %s514_s8  ;;  %v478_v52 = vstv %s515_s9 }
  0xb7   :  { %v257_v14 = vadd.f32 %v256_v15, %v255_v0  ;;  %v313_v55 = vsel %vm312_vm9, %v250_v19, %v311_v20  ;;  %v468_v46 = vmul.f32 %v467_v39, %v464_v5  ;;  %v471_v47 = vmul.f32 %v470_v40, %v465_v38 }
  0xb8   :  { %v315_v11 = vsel %vm314_vm10, %v263_v13, %v313_v55  ;;  %vm480_vm7 = vcmask 57344  }
  0xb9   :  { %v322_v24 = vsel %vm312_vm9, %v257_v14, %v321_v63  ;;  %v317_v25 = vsel %vm316_vm11, %v276_v22, %v315_v11  ;;  %v472_v50 = vadd.f32 %v471_v47, %v468_v46 }
  0xba   :  { %v323_v26 = vsel %vm314_vm10, %v270_v18, %v322_v24  ;;  %345 = vmatpush.xpose.msra.mxu0 %v317_v25 }
  0xbb   :  { %v324_v27 = vsel %vm316_vm11, %v283_v23, %v323_v26 }
  0xbc   :  { %509 = vmatpush.xpose.msk.msra.mxu1 %vm185_vm3, %v324_v27 }
  0xbd   :  { %346 = vmatmul.f32.vlgmr.msra.gmra.mxu0 %v285_v3 }
  0xbf   :  { %510 = vmatmul.msk.f32.vlgmr.msra.gmra.mxu1 %vm185_vm3, %v286_v1 }
 0x129   :  { %v442_v28 = vpop.f32.mrf.mxu2 }
 0x12a   :  { %v445_v29 = vmul.f32 4.0, %v442_v28 }
 0x12c   :  { %v447_v30 = vmax.f32 %v445_v29, 1.0  ;;  %vm446_vm6 = vcmp.gt.f32.partialorder %v445_v29, 0.0 }
 0x12e   :  { %550 = vrcp.f32 %v447_v30  ;;  %v459_v34 = vand.u32 2147483648, %v447_v30  ;;  %v457_v36 = vand.u32 2147483647, %v447_v30  ;;  %vm453_vm3 = vweird.f32 %v447_v30 }
 0x130   :  { %v460_v43 = vor.u32 1.1754944e-38, %v459_v34  ;;  %vm458_vm5 = vcmp.eq.f32.partialorder %v457_v36, 8.507059e+37 }
 0x134   :  { %v551_v31 = vpop.eup %550 }
 0x135   :  { %v449_v32 = vmul.f32 %v551_v31, %v447_v30  ;;  %vm454_vm4 = vweird.f32 %v551_v31 }
 0x136   :  { %vm455_vm2 = vmor %vm453_vm3, %vm454_vm4 }
 0x137   :  { %v450_v33 = vsub.f32 1.0, %v449_v32 }
 0x139   :  { %v451_v35 = vmul.f32 %v551_v31, %v450_v33 }
 0x13a   :  { %v347_v42 = vpop.f32.mrf.mxu0 }
 0x13b   :  { %v452_v41 = vadd.f32 %v551_v31, %v451_v35 }
 0x13c   :  { %v367_v44 = vpop.f32.mrf.mxu1 }
 0x13d   :  { %v456_v45 = vsel %vm455_vm2, %v551_v31, %v452_v41  ;;  %v368_v37 = vadd.f32 %v367_v44, %v347_v42 }
 0x13e   :  { %v461_v48 = vsel %vm458_vm5, %v460_v43, %v456_v45 }
 0x13f   :  { %v462_v49 = vmul.f32 %v461_v48, %v368_v37 }
 0x141   :  { %v463_v6 = vsel %vm446_vm6, %v462_v49, 0.0 }
 0x142   :  { %v475_v51 = vmul.f32 %v474_v2, %v463_v6 }
 0x144   :  { %v476_v53 = vadd.f32 %v475_v51, %v472_v50 }
 0x146   :  { %v479_v54 = vadd.f32 %v478_v52, %v476_v53 }
 0x148   :  { %481 = vst.msk [vmem:[#allocation10] sm:$0x1] %vm480_vm7, %v479_v54 }
 0x149   :  { %492 = dma.vmem_to_hbm [thread:$0]  %s488_s11, 16, %s490_s14, [#allocation4]  }
 0x14a   :  { %666 = dma.done.wait [#allocation4], 16  }
 0x14b   :  { %667 = vsyncadd [#allocation4], 4294967280 }
 0x14c   :  { %497 = vsyncpa [#allocation3], 1 }
 0x14d   :  { %498 = vsyncpa [#allocation7], 1 }
 0x14e   :  { %499 = vsyncpa [#allocation4], 1 }
 0x14f   :  { %500 = vsyncpa [#allocation5], 1 }

</bundles_post_ra>
